<compile_context>
chip_gen: v7x
topology: tpu7x:2x2x1
jax: 0.10.0
libtpu: 0.0.40
codegen_flags: <defaults>
</compile_context>

<pallas_src>
import math

import numpy as np
import jax
import jax.numpy as jnp
from jax.experimental import pallas as pl
from jax.experimental.pallas import tpu as pltpu

PATCH_LEN = 4
STRIDE = 2
EPS = 1e-5


# ----------------------------------------------------------------------------
# Fused forward kernel: ONE invocation for the whole batch, everything in VMEM.
# ----------------------------------------------------------------------------
def _mwinformer_fused_kernel(x_ref, wbig_ref, bbig_ref, h2_ref, b2_ref, out_ref):
    """Whole forecast path, time-major (time on sublanes, channels on lanes).

    x_ref    : (B, L, C)   raw series in natural layout (no host transpose)
    wbig_ref : (3P, L)     pre-folded [shift-right ; center ; shift-left] of
                           (pad + unfold + value-embed + head1)^T
    bbig_ref : (3P, 1)     matching pre-folded bias (column vector)
    h2_ref   : (3, C, C)   conv1d taps, transposed to (k, Cin, Cout)
    b2_ref   : (1, C)      conv1d bias (row vector)
    out_ref  : (B, P, 2C)  [dec1 | dec2] lane-concatenated, already de-normalized
    """
    B, L, C = x_ref.shape
    P = out_ref.shape[1]

    wbig = wbig_ref[...]                                   # (3P, L)
    bbig = bbig_ref[...]                                   # (3P, 1)
    h2_0 = h2_ref[0]                                       # (C, C)
    h2_1 = h2_ref[1]
    h2_2 = h2_ref[2]
    b2 = b2_ref[...]                                       # (1, C)

    for b in range(B):                                     # static unroll, B is tiny
        x = x_ref[b]                                       # (L, C)

        # ---- instance normalization over time (biased variance, eps=1e-5) ----
        mean = jnp.mean(x, axis=0, keepdims=True)          # (1, C)
        xc = x - mean
        veps = jnp.mean(xc * xc, axis=0, keepdims=True) + EPS
        inv_std = jax.lax.rsqrt(veps)                      # EUP slot (free-ish)
        std = veps * inv_std                               # = sqrt(var + eps), mul only
        xn = xc * inv_std                                  # (L, C)

        # ---- pad/unfold/value-embed/pos-embed/head1 (+ conv column shifts): one matmul ----
        y = jnp.dot(wbig, xn, preferred_element_type=jnp.float32) + bbig   # (3P, C)
        out1 = y[P:2 * P, :]                               # center segment == head1 output

        # ---- head2: Conv1d(C, C, k=3, pad=1) as 3 matmuls on aligned sublane slices ----
        out2 = (jnp.dot(y[0:P, :], h2_0, preferred_element_type=jnp.float32)
                + jnp.dot(out1, h2_1, preferred_element_type=jnp.float32)
                + jnp.dot(y[2 * P:3 * P, :], h2_2, preferred_element_type=jnp.float32)
                + b2)                                      # (P, C)

        # ---- de-normalize; already in the module's (P, C) output layout ----
        dec1 = out1 * std + mean
        dec2 = out2 * std + mean
        out_ref[b] = jnp.concatenate([dec1, dec2], axis=-1)   # (P, 2C) single dense store


# ----------------------------------------------------------------------------
# Sinusoidal positional embedding (TSLib PositionalEmbedding), built once at init.
# ----------------------------------------------------------------------------
def positional_embedding(n, d):
    pos = jnp.arange(n, dtype=jnp.float32)[:, None]
    div = jnp.exp(jnp.arange(0, d, 2, dtype=jnp.float32) * (-math.log(10000.0) / d))
    pe = jnp.zeros((n, d), dtype=jnp.float32)
    pe = pe.at[:, 0::2].set(jnp.sin(pos * div))
    pe = pe.at[:, 1::2].set(jnp.cos(pos * div))
    return pe


# ----------------------------------------------------------------------------
# Parameters: raw (PyTorch-layout) weights + one-time folding into kernel matrices.
# ----------------------------------------------------------------------------
class Config:
    task_name = "long_term_forecast"
    seq_len = 16
    pred_len = 8
    enc_in = 4
    d_model = 16


def init_params(cfg, key):
    k1, k2, k3, k4, k5 = jax.random.split(key, 5)
    D, P, C, L = cfg.d_model, cfg.pred_len, cfg.enc_in, cfg.seq_len
    N = int((L - PATCH_LEN) / STRIDE + 2)                  # pad_out_len
    head_nf = D * N

    def uni(k, shape, fan_in):
        bound = 1.0 / math.sqrt(fan_in)
        return jax.random.uniform(k, shape, jnp.float32, -bound, bound)

    pe_w = uni(k1, (PATCH_LEN, D), PATCH_LEN)              # Linear(patch_len->d_model), no bias
    pos = positional_embedding(N, D)                       # (N, D)
    h1_w = uni(k2, (head_nf, P), head_nf)                  # Linear(head_nf->pred_len).weight^T
    h1_b = uni(k3, (P,), head_nf)
    h2_w = uni(k4, (C, C, 3), C * 3)                       # Conv1d(C, C, k=3): (Cout, Cin, K)
    h2_b = uni(k5, (C,), C * 3)

    raw = dict(pe_w=pe_w, pos=pos, h1_w=h1_w, h1_b=h1_b, h2_w=h2_w, h2_b=h2_b)

    # ---- one-time folding (never re-done in the forward path) ----
    # A[l, n, j] = 1 iff time step l feeds tap j of patch n (replication pad folded in).
    A = np.zeros((L, N, PATCH_LEN), np.float32)
    for n in range(N):
        for j in range(PATCH_LEN):
            A[min(n * STRIDE + j, L - 1), n, j] = 1.0
    w_embed = jnp.einsum("lnj,jd->lnd", jnp.asarray(A), pe_w)          # (L, N, D)
    w_embed = jnp.transpose(w_embed, (0, 2, 1)).reshape(L, head_nf)    # '(d_model seg_num)' cols
    pos_flat = pos.T.reshape(1, head_nf)                               # d-major flatten

    w1 = w_embed @ h1_w                                    # (L, P)   embed + head1 folded
    b1 = (pos_flat @ h1_w)[0] + h1_b                       # (P,)

    # Column-shift matrices for the k=3, pad=1 conv:  (x @ S_k)[:, p] = x[:, p+k-1] (0-padded)
    s0 = jnp.asarray(np.eye(P, k=1, dtype=np.float32))
    s2 = jnp.asarray(np.eye(P, k=-1, dtype=np.float32))
    w_big = jnp.concatenate([w1 @ s0, w1, w1 @ s2], axis=1)            # (L, 3P)
    b_big = jnp.concatenate([b1 @ s0, b1, b1 @ s2])                    # (3P,)

    fused = dict(
        w_big_t=w_big.T,                                   # (3P, L)  time-major weight
        b_big=b_big.reshape(3 * P, 1),                     # (3P, 1)
        h2_t=jnp.transpose(h2_w, (2, 1, 0)),               # (3, Cin, Cout)
        b2=h2_b.reshape(1, C),                             # (1, C)
    )
    return dict(raw=raw, fused=fused)


# ----------------------------------------------------------------------------
# Forward pass: one pallas_call, no host-side transposes.
# ----------------------------------------------------------------------------
def model_forward(fused, x_enc):
    """x_enc: (B, L, C) -> (dec1, dec2), each (B, pred_len, C)."""
    B, L, C = x_enc.shape
    wbig_t, bbig, h2t, b2 = fused["w_big_t"], fused["b_big"], fused["h2_t"], fused["b2"]
    P = wbig_t.shape[0] // 3

    out = pl.pallas_call(
        _mwinformer_fused_kernel,
        out_shape=jax.ShapeDtypeStruct((B, P, 2 * C), jnp.float32),
        grid=(1,),                                         # single step: overhead-bound problem
        in_specs=[
            pl.BlockSpec((B, L, C), lambda i: (0, 0, 0)),
            pl.BlockSpec(wbig_t.shape, lambda i: (0, 0)),
            pl.BlockSpec(bbig.shape, lambda i: (0, 0)),
            pl.BlockSpec(h2t.shape, lambda i: (0, 0, 0)),
            pl.BlockSpec(b2.shape, lambda i: (0, 0)),
        ],
        out_specs=pl.BlockSpec((B, P, 2 * C), lambda i: (0, 0, 0)),
        compiler_params=pltpu.CompilerParams(dimension_semantics=("arbitrary",)),
    )(x_enc, wbig_t, bbig, h2t, b2)

    return out[..., :C], out[..., C:]


# ----------------------------------------------------------------------------
# Pure-JAX mirror of the ORIGINAL op sequence (self-check of the folding).
# ----------------------------------------------------------------------------
def reference_forward(raw, x_enc):
    pe_w, pos, h1_w, h1_b, h2_w, h2_b = (raw["pe_w"], raw["pos"], raw["h1_w"],
                                         raw["h1_b"], raw["h2_w"], raw["h2_b"])
    B, L, C = x_enc.shape
    N, D = pos.shape
    P = h1_w.shape[1]
    mean = jnp.mean(x_enc, axis=1, keepdims=True)
    xc = x_enc - mean
    std = jnp.sqrt(jnp.mean(xc * xc, axis=1, keepdims=True) + EPS)
    xn = xc / std
    x_cl = jnp.transpose(xn, (0, 2, 1))                                    # (B, C, L)
    xp = jnp.concatenate([x_cl] + [x_cl[:, :, -1:]] * STRIDE, axis=2)      # replication pad
    patches = jnp.stack([xp[:, :, n * STRIDE:n * STRIDE + PATCH_LEN] for n in range(N)], axis=2)
    emb = jnp.einsum("bcnj,jd->bcnd", patches, pe_w) + pos[None, None]     # (B, C, N, D)
    enc = jnp.transpose(emb, (0, 1, 3, 2)).reshape(B, C, D * N)            # '(d_model seg_num)'
    out1 = enc @ h1_w + h1_b                                               # (B, C, P)
    op = jnp.pad(out1, ((0, 0), (0, 0), (1, 1)))
    out2 = sum(jnp.einsum("oi,bip->bop", h2_w[:, :, k], op[:, :, k:k + P]) for k in range(3))
    out2 = out2 + h2_b[None, :, None]
    dec1 = jnp.transpose(out1, (0, 2, 1)) * std + mean
    dec2 = jnp.transpose(out2, (0, 2, 1)) * std + mean
    return dec1, dec2


if __name__ == "__main__":
    cfg = Config()
    key = jax.random.PRNGKey(0)
    kp, kx = jax.random.split(key)
    params = init_params(cfg, kp)

    # example input (x_mark_enc / x_dec / x_mark_dec are unused by the forecast path)
    x_enc = jax.random.normal(kx, (2, cfg.seq_len, cfg.enc_in), dtype=jnp.float32)

    fwd = jax.jit(model_forward)
    dec1, dec2 = fwd(params["fused"], x_enc)
    dec1, dec2 = jax.block_until_ready((dec1, dec2))

    assert dec1.shape == (2, cfg.pred_len, cfg.enc_in)
    assert dec2.shape == (2, cfg.pred_len, cfg.enc_in)
    assert bool(jnp.all(jnp.isfinite(dec1))) and bool(jnp.all(jnp.isfinite(dec2)))

    # self-check of the weight folding against the original op sequence
    ref1, ref2 = reference_forward(params["raw"], x_enc)
    assert bool(jnp.allclose(dec1, ref1, atol=5e-2, rtol=5e-2))
    assert bool(jnp.allclose(dec2, ref2, atol=5e-2, rtol=5e-2))

    print("KERNEL_OK")
</pallas_src>

<mosaic_0001>
module attributes {stable_mosaic.version = 11 : i64} {
  func.func @_mwinformer_fused_kernel(%arg0: i32, %arg1: memref<2x16x4xf32, #tpu.memory_space<vmem>>, %arg2: memref<24x16xf32, #tpu.memory_space<vmem>>, %arg3: memref<24x1xf32, #tpu.memory_space<vmem>>, %arg4: memref<3x4x4xf32, #tpu.memory_space<vmem>>, %arg5: memref<1x4xf32, #tpu.memory_space<vmem>>, %arg6: memref<2x8x8xf32, #tpu.memory_space<vmem>>) attributes {dimension_semantics = [#tpu.dimension_semantics<arbitrary>], iteration_bounds = array<i64: 1>, scalar_prefetch = 0 : i64, scratch_operands = 0 : i64, tpu.core_type = #tpu.core_type<tc>, window_params = [{pipeline_mode = #tpu.pipeline_mode<synchronous>, transform_indices = @transform_0, window_bounds = array<i64: 2, 16, 4>}, {pipeline_mode = #tpu.pipeline_mode<synchronous>, transform_indices = @transform_1, window_bounds = array<i64: 24, 16>}, {pipeline_mode = #tpu.pipeline_mode<synchronous>, transform_indices = @transform_2, window_bounds = array<i64: 24, 1>}, {pipeline_mode = #tpu.pipeline_mode<synchronous>, transform_indices = @transform_3, window_bounds = array<i64: 3, 4, 4>}, {pipeline_mode = #tpu.pipeline_mode<synchronous>, transform_indices = @transform_4, window_bounds = array<i64: 1, 4>}, {pipeline_mode = #tpu.pipeline_mode<synchronous>, transform_indices = @transform_5, window_bounds = array<i64: 2, 8, 8>}]} {
    %c0 = arith.constant 0 : index
    %c0_0 = arith.constant 0 : index
    %0 = vector.load %arg2[%c0, %c0_0] : memref<24x16xf32, #tpu.memory_space<vmem>>, vector<24x16xf32>
    %c0_1 = arith.constant 0 : index
    %c0_2 = arith.constant 0 : index
    %1 = vector.load %arg3[%c0_1, %c0_2] : memref<24x1xf32, #tpu.memory_space<vmem>>, vector<24x1xf32>
    %c0_3 = arith.constant 0 : index
    %c0_4 = arith.constant 0 : index
    %c0_5 = arith.constant 0 : index
    %2 = vector.load %arg4[%c0_3, %c0_4, %c0_5] : memref<3x4x4xf32, #tpu.memory_space<vmem>>, vector<1x4x4xf32>
    %3 = vector.shape_cast %2 : vector<1x4x4xf32> to vector<4x4xf32>
    %c1 = arith.constant 1 : index
    %c0_6 = arith.constant 0 : index
    %c0_7 = arith.constant 0 : index
    %4 = vector.load %arg4[%c1, %c0_6, %c0_7] : memref<3x4x4xf32, #tpu.memory_space<vmem>>, vector<1x4x4xf32>
    %5 = vector.shape_cast %4 : vector<1x4x4xf32> to vector<4x4xf32>
    %c2 = arith.constant 2 : index
    %c0_8 = arith.constant 0 : index
    %c0_9 = arith.constant 0 : index
    %6 = vector.load %arg4[%c2, %c0_8, %c0_9] : memref<3x4x4xf32, #tpu.memory_space<vmem>>, vector<1x4x4xf32>
    %7 = vector.shape_cast %6 : vector<1x4x4xf32> to vector<4x4xf32>
    %c0_10 = arith.constant 0 : index
    %c0_11 = arith.constant 0 : index
    %8 = vector.load %arg5[%c0_10, %c0_11] : memref<1x4xf32, #tpu.memory_space<vmem>>, vector<1x4xf32>
    %c0_12 = arith.constant 0 : index
    %c0_13 = arith.constant 0 : index
    %c0_14 = arith.constant 0 : index
    %9 = vector.load %arg1[%c0_12, %c0_13, %c0_14] : memref<2x16x4xf32, #tpu.memory_space<vmem>>, vector<1x16x4xf32>
    %10 = vector.shape_cast %9 : vector<1x16x4xf32> to vector<16x4xf32>
    %cst = arith.constant dense<0.000000e+00> : vector<4xf32>
    %11 = vector.multi_reduction <add>, %10, %cst [0] : vector<16x4xf32> to vector<4xf32>
    %12 = vector.shape_cast %11 : vector<4xf32> to vector<1x4xf32>
    %cst_15 = arith.constant 1.600000e+01 : f32
    %13 = vector.broadcast %cst_15 : f32 to vector<1x4xf32>
    %14 = arith.divf %12, %13 : vector<1x4xf32>
    %15 = vector.broadcast %14 : vector<1x4xf32> to vector<16x4xf32>
    %16 = arith.subf %10, %15 : vector<16x4xf32>
    %17 = arith.mulf %16, %16 : vector<16x4xf32>
    %cst_16 = arith.constant dense<0.000000e+00> : vector<4xf32>
    %18 = vector.multi_reduction <add>, %17, %cst_16 [0] : vector<16x4xf32> to vector<4xf32>
    %19 = vector.shape_cast %18 : vector<4xf32> to vector<1x4xf32>
    %cst_17 = arith.constant 1.600000e+01 : f32
    %20 = vector.broadcast %cst_17 : f32 to vector<1x4xf32>
    %21 = arith.divf %19, %20 : vector<1x4xf32>
    %cst_18 = arith.constant 9.99999974E-6 : f32
    %22 = vector.broadcast %cst_18 : f32 to vector<1x4xf32>
    %23 = arith.addf %21, %22 : vector<1x4xf32>
    %24 = math.rsqrt %23 : vector<1x4xf32>
    %25 = arith.mulf %23, %24 : vector<1x4xf32>
    %26 = vector.broadcast %24 : vector<1x4xf32> to vector<16x4xf32>
    %27 = arith.mulf %16, %26 : vector<16x4xf32>
    %cst_19 = arith.constant dense<0.000000e+00> : vector<24x4xf32>
    %28 = tpu.matmul %0, %27, %cst_19 {dimension_numbers = #tpu.dot_dimension_numbers<[1], [0], [0], [1], [0, 0, 1, 1], [], []>} : vector<24x16xf32>, vector<16x4xf32>, vector<24x4xf32> -> vector<24x4xf32>
    %29 = vector.broadcast %1 : vector<24x1xf32> to vector<24x4xf32>
    %30 = arith.addf %28, %29 : vector<24x4xf32>
    %31 = vector.extract_strided_slice %30 {offsets = [8, 0], sizes = [8, 4], strides = [1, 1]} : vector<24x4xf32> to vector<8x4xf32>
    %32 = vector.extract_strided_slice %30 {offsets = [0, 0], sizes = [8, 4], strides = [1, 1]} : vector<24x4xf32> to vector<8x4xf32>
    %cst_20 = arith.constant dense<0.000000e+00> : vector<8x4xf32>
    %33 = tpu.matmul %32, %3, %cst_20 {dimension_numbers = #tpu.dot_dimension_numbers<[1], [0], [0], [1], [0, 0, 1, 1], [], []>} : vector<8x4xf32>, vector<4x4xf32>, vector<8x4xf32> -> vector<8x4xf32>
    %cst_21 = arith.constant dense<0.000000e+00> : vector<8x4xf32>
    %34 = tpu.matmul %31, %5, %cst_21 {dimension_numbers = #tpu.dot_dimension_numbers<[1], [0], [0], [1], [0, 0, 1, 1], [], []>} : vector<8x4xf32>, vector<4x4xf32>, vector<8x4xf32> -> vector<8x4xf32>
    %35 = arith.addf %33, %34 : vector<8x4xf32>
    %36 = vector.extract_strided_slice %30 {offsets = [16, 0], sizes = [8, 4], strides = [1, 1]} : vector<24x4xf32> to vector<8x4xf32>
    %cst_22 = arith.constant dense<0.000000e+00> : vector<8x4xf32>
    %37 = tpu.matmul %36, %7, %cst_22 {dimension_numbers = #tpu.dot_dimension_numbers<[1], [0], [0], [1], [0, 0, 1, 1], [], []>} : vector<8x4xf32>, vector<4x4xf32>, vector<8x4xf32> -> vector<8x4xf32>
    %38 = arith.addf %35, %37 : vector<8x4xf32>
    %39 = vector.broadcast %8 : vector<1x4xf32> to vector<8x4xf32>
    %40 = arith.addf %38, %39 : vector<8x4xf32>
    %41 = vector.broadcast %25 : vector<1x4xf32> to vector<8x4xf32>
    %42 = arith.mulf %31, %41 : vector<8x4xf32>
    %43 = vector.broadcast %14 : vector<1x4xf32> to vector<8x4xf32>
    %44 = arith.addf %42, %43 : vector<8x4xf32>
    %45 = vector.broadcast %25 : vector<1x4xf32> to vector<8x4xf32>
    %46 = arith.mulf %40, %45 : vector<8x4xf32>
    %47 = vector.broadcast %14 : vector<1x4xf32> to vector<8x4xf32>
    %48 = arith.addf %46, %47 : vector<8x4xf32>
    %49 = tpu.concatenate %44, %48 in 1 : vector<8x4xf32>, vector<8x4xf32> -> vector<8x8xf32>
    %c0_23 = arith.constant 0 : index
    %c0_24 = arith.constant 0 : index
    %c0_25 = arith.constant 0 : index
    %50 = vector.load %arg6[%c0_23, %c0_24, %c0_25] : memref<2x8x8xf32, #tpu.memory_space<vmem>>, vector<1x8x8xf32>
    %51 = vector.shape_cast %50 : vector<1x8x8xf32> to vector<8x8xf32>
    %52 = vector.shape_cast %49 : vector<8x8xf32> to vector<1x8x8xf32>
    tpu.vector_store %arg6[%c0_23, %c0_24, %c0_25], %52 {strides = array<i32>} : memref<2x8x8xf32, #tpu.memory_space<vmem>>, vector<1x8x8xf32>,
    %c1_26 = arith.constant 1 : index
    %c0_27 = arith.constant 0 : index
    %c0_28 = arith.constant 0 : index
    %53 = vector.load %arg1[%c1_26, %c0_27, %c0_28] : memref<2x16x4xf32, #tpu.memory_space<vmem>>, vector<1x16x4xf32>
    %54 = vector.shape_cast %53 : vector<1x16x4xf32> to vector<16x4xf32>
    %cst_29 = arith.constant dense<0.000000e+00> : vector<4xf32>
    %55 = vector.multi_reduction <add>, %54, %cst_29 [0] : vector<16x4xf32> to vector<4xf32>
    %56 = vector.shape_cast %55 : vector<4xf32> to vector<1x4xf32>
    %cst_30 = arith.constant 1.600000e+01 : f32
    %57 = vector.broadcast %cst_30 : f32 to vector<1x4xf32>
    %58 = arith.divf %56, %57 : vector<1x4xf32>
    %59 = vector.broadcast %58 : vector<1x4xf32> to vector<16x4xf32>
    %60 = arith.subf %54, %59 : vector<16x4xf32>
    %61 = arith.mulf %60, %60 : vector<16x4xf32>
    %cst_31 = arith.constant dense<0.000000e+00> : vector<4xf32>
    %62 = vector.multi_reduction <add>, %61, %cst_31 [0] : vector<16x4xf32> to vector<4xf32>
    %63 = vector.shape_cast %62 : vector<4xf32> to vector<1x4xf32>
    %cst_32 = arith.constant 1.600000e+01 : f32
    %64 = vector.broadcast %cst_32 : f32 to vector<1x4xf32>
    %65 = arith.divf %63, %64 : vector<1x4xf32>
    %cst_33 = arith.constant 9.99999974E-6 : f32
    %66 = vector.broadcast %cst_33 : f32 to vector<1x4xf32>
    %67 = arith.addf %65, %66 : vector<1x4xf32>
    %68 = math.rsqrt %67 : vector<1x4xf32>
    %69 = arith.mulf %67, %68 : vector<1x4xf32>
    %70 = vector.broadcast %68 : vector<1x4xf32> to vector<16x4xf32>
    %71 = arith.mulf %60, %70 : vector<16x4xf32>
    %cst_34 = arith.constant dense<0.000000e+00> : vector<24x4xf32>
    %72 = tpu.matmul %0, %71, %cst_34 {dimension_numbers = #tpu.dot_dimension_numbers<[1], [0], [0], [1], [0, 0, 1, 1], [], []>} : vector<24x16xf32>, vector<16x4xf32>, vector<24x4xf32> -> vector<24x4xf32>
    %73 = vector.broadcast %1 : vector<24x1xf32> to vector<24x4xf32>
    %74 = arith.addf %72, %73 : vector<24x4xf32>
    %75 = vector.extract_strided_slice %74 {offsets = [8, 0], sizes = [8, 4], strides = [1, 1]} : vector<24x4xf32> to vector<8x4xf32>
    %76 = vector.extract_strided_slice %74 {offsets = [0, 0], sizes = [8, 4], strides = [1, 1]} : vector<24x4xf32> to vector<8x4xf32>
    %cst_35 = arith.constant dense<0.000000e+00> : vector<8x4xf32>
    %77 = tpu.matmul %76, %3, %cst_35 {dimension_numbers = #tpu.dot_dimension_numbers<[1], [0], [0], [1], [0, 0, 1, 1], [], []>} : vector<8x4xf32>, vector<4x4xf32>, vector<8x4xf32> -> vector<8x4xf32>
    %cst_36 = arith.constant dense<0.000000e+00> : vector<8x4xf32>
    %78 = tpu.matmul %75, %5, %cst_36 {dimension_numbers = #tpu.dot_dimension_numbers<[1], [0], [0], [1], [0, 0, 1, 1], [], []>} : vector<8x4xf32>, vector<4x4xf32>, vector<8x4xf32> -> vector<8x4xf32>
    %79 = arith.addf %77, %78 : vector<8x4xf32>
    %80 = vector.extract_strided_slice %74 {offsets = [16, 0], sizes = [8, 4], strides = [1, 1]} : vector<24x4xf32> to vector<8x4xf32>
    %cst_37 = arith.constant dense<0.000000e+00> : vector<8x4xf32>
    %81 = tpu.matmul %80, %7, %cst_37 {dimension_numbers = #tpu.dot_dimension_numbers<[1], [0], [0], [1], [0, 0, 1, 1], [], []>} : vector<8x4xf32>, vector<4x4xf32>, vector<8x4xf32> -> vector<8x4xf32>
    %82 = arith.addf %79, %81 : vector<8x4xf32>
    %83 = vector.broadcast %8 : vector<1x4xf32> to vector<8x4xf32>
    %84 = arith.addf %82, %83 : vector<8x4xf32>
    %85 = vector.broadcast %69 : vector<1x4xf32> to vector<8x4xf32>
    %86 = arith.mulf %75, %85 : vector<8x4xf32>
    %87 = vector.broadcast %58 : vector<1x4xf32> to vector<8x4xf32>
    %88 = arith.addf %86, %87 : vector<8x4xf32>
    %89 = vector.broadcast %69 : vector<1x4xf32> to vector<8x4xf32>
    %90 = arith.mulf %84, %89 : vector<8x4xf32>
    %91 = vector.broadcast %58 : vector<1x4xf32> to vector<8x4xf32>
    %92 = arith.addf %90, %91 : vector<8x4xf32>
    %93 = tpu.concatenate %88, %92 in 1 : vector<8x4xf32>, vector<8x4xf32> -> vector<8x8xf32>
    %c1_38 = arith.constant 1 : index
    %c0_39 = arith.constant 0 : index
    %c0_40 = arith.constant 0 : index
    %94 = vector.load %arg6[%c1_38, %c0_39, %c0_40] : memref<2x8x8xf32, #tpu.memory_space<vmem>>, vector<1x8x8xf32>
    %95 = vector.shape_cast %94 : vector<1x8x8xf32> to vector<8x8xf32>
    %96 = vector.shape_cast %93 : vector<8x8xf32> to vector<1x8x8xf32>
    tpu.vector_store %arg6[%c1_38, %c0_39, %c0_40], %96 {strides = array<i32>} : memref<2x8x8xf32, #tpu.memory_space<vmem>>, vector<1x8x8xf32>,
    return
  }
  func.func @transform_0(%arg0: i32) -> (i32, i32, i32) {
    %c0_i32 = arith.constant 0 : i32
    %c0_i32_0 = arith.constant 0 : i32
    %c0_i32_1 = arith.constant 0 : i32
    %c0_i32_2 = arith.constant 0 : i32
    return %c0_i32, %c0_i32_0, %c0_i32_1 : i32, i32, i32
  }
  func.func @transform_1(%arg0: i32) -> (i32, i32) {
    %c0_i32 = arith.constant 0 : i32
    %c0_i32_0 = arith.constant 0 : i32
    %c0_i32_1 = arith.constant 0 : i32
    return %c0_i32, %c0_i32_0 : i32, i32
  }
  func.func @transform_2(%arg0: i32) -> (i32, i32) {
    %c0_i32 = arith.constant 0 : i32
    %c0_i32_0 = arith.constant 0 : i32
    %c0_i32_1 = arith.constant 0 : i32
    return %c0_i32, %c0_i32_0 : i32, i32
  }
  func.func @transform_3(%arg0: i32) -> (i32, i32, i32) {
    %c0_i32 = arith.constant 0 : i32
    %c0_i32_0 = arith.constant 0 : i32
    %c0_i32_1 = arith.constant 0 : i32
    %c0_i32_2 = arith.constant 0 : i32
    return %c0_i32, %c0_i32_0, %c0_i32_1 : i32, i32, i32
  }
  func.func @transform_4(%arg0: i32) -> (i32, i32) {
    %c0_i32 = arith.constant 0 : i32
    %c0_i32_0 = arith.constant 0 : i32
    %c0_i32_1 = arith.constant 0 : i32
    return %c0_i32, %c0_i32_0 : i32, i32
  }
  func.func @transform_5(%arg0: i32) -> (i32, i32, i32) {
    %c0_i32 = arith.constant 0 : i32
    %c0_i32_0 = arith.constant 0 : i32
    %c0_i32_1 = arith.constant 0 : i32
    %c0_i32_2 = arith.constant 0 : i32
    return %c0_i32, %c0_i32_0, %c0_i32_1 : i32, i32, i32
  }
}

</mosaic_0001>

<bundles_post_ra>
// kernel: model_forward.1
= control target key start
LH: loop header
LB: loop body
LE: loop exit
PB: predicated region body
PF: predicated region fallthrough
CT: control target
= control target key end

     0   :  { %vm34_vm0 = vcmask 31744   ;;  %v885_v0 = vmov 0.0|0.0   ;;  %vm886_vm1 = vmmov 0   ;;  %v887_v3 = vmov 0.0   ;;  %s889_s17 = smov 4   ;;  %s1074_s0 = inlined_call_operand.vmem [shape: f32[2,16,4], index: 0, kind: input, shape index: {}]   ;;  %s1075_s2 = inlined_call_operand.vmem [shape: f32[24,1], index: 2, kind: input, shape index: {}]   ;;  %s1076_s1 = inlined_call_operand.vmem [shape: f32[24,16], index: 1, kind: input, shape index: {}]   ;;  %s1077_s3 = inlined_call_operand.vmem [shape: f32[3,4,4], index: 3, kind: input, shape index: {}]   ;;  %s1078_s4 = inlined_call_operand.vmem [shape: f32[1,4], index: 4, kind: input, shape index: {}]   ;;  %s1079_s5 = inlined_call_operand.vmem [shape: f32[2,8,8], index: 5, kind: output, shape index: {}]  }
   0x1   :  { %868 = vmatprep.subr.bf16.mxu0 %v885_v0  ;;  %v32_v1 = vld [vmem:[%s1074_s0] sm:$0xff]  ;;  %v33_v2 = vld [vmem:[%s1074_s0 + $0x8] sm:$0xff]  ;;  %816 = vmatprep.mubr.msk.f32.mxu0 %vm886_vm1, %v887_v3  ;;  %v888_v6 = vmov 0   ;;  %v25_v9 = vld [vmem:[%s1075_s2 + $0x10] sm:$0xff]  ;;  %vm80_vm2 = vcmask 130048   ;;  %vm173_vm3 = vcmask 1043456  }
   0x2   :  { %v35_v4 = vsel %vm34_vm0, %v32_v1, 0.0  ;;  %v36_v5 = vsel %vm34_vm0, %v33_v2, 0.0  ;;  %879 = vset.pattern.permute.xlu0 %v888_v6  ;;  %v24_v7 = vld [vmem:[%s1075_s2 + $0x8] sm:$0xff]  ;;  %880 = vset.pattern.permute.xlu1 %v888_v6  ;;  %v23_v10 = vld [vmem:[%s1075_s2] sm:$0xff]  ;;  %v978_v39 = vld [vmem:[%s1076_s1 + $0x10] sm:$0xff]  ;;  %vm416_vm4 = vcmask 64512  }
   0x3   :  { %v37_v8 = vadd.f32 %v36_v5, %v35_v4  ;;  %72 = vperm.xlu0 %879, %v24_v7   ;;  %825 = vmatprep.subr.mxu1 %v887_v3  ;;  %v959_v37 = vld [vmem:[%s1076_s1] sm:$0xff]  ;;  %v969_v38 = vld [vmem:[%s1076_s1 + $0x8] sm:$0xff]  ;;  %v778_v41 = vld [vmem:[%s1074_s0 + $0x10] sm:$0xff] }
   0x4   :  { %77 = vperm.xlu1 %880, %v25_v9   ;;  %827 = vmatprep.mubr.msk.f32.mxu1 %vm886_vm1, %v887_v3  ;;  %v766_v40 = vld [vmem:[%s1077_s3 + $0x4] sm:$0xf]  ;;  %v779_v42 = vld [vmem:[%s1074_s0 + $0x18] sm:$0xff]  ;;  %v421_v43 = vsel %vm34_vm0, %v778_v41, 0.0 }
   0x5   :  { %v38_v11 = vrot.slane %v37_v8, 4  ;;  %826 = vmatpush3.msk.msra.mxu1 %vm173_vm3, %v766_v40  ;;  %v422_v44 = vsel %vm34_vm0, %v779_v42, 0.0 }
   0x6   :  { %830 = vmatprep.subr.mxu1 %v887_v3  ;;  %v423_v45 = vadd.f32 %v422_v44, %v421_v43 }
   0x7   :  { %v39_v12 = vadd.f32 %v38_v11, %v37_v8  ;;  %67 = vperm.xlu0 %879, %v23_v10  }
   0x8   :  { %v424_v46 = vrot.slane %v423_v45, 4 }
   0x9   :  { %v40_v13 = vrot.slane %v39_v12, 2 }
   0xa   :  { %v425_v47 = vadd.f32 %v424_v46, %v423_v45 }
   0xb   :  { %v41_v14 = vadd.f32 %v40_v13, %v39_v12  ;;  %v26_v13 = vld [vmem:[%s1077_s3] sm:$0xf] }
   0xc   :  { %v426_v48 = vrot.slane %v425_v47, 2 }
   0xd   :  { %v42_v15 = vrot.slane %v41_v14, 1 }
   0xe   :  { %v427_v49 = vadd.f32 %v426_v48, %v425_v47 }
   0xf   :  { %v43_v16 = vadd.f32 %v42_v15, %v41_v14 }
  0x10   :  { %v428_v50 = vrot.slane %v427_v49, 1 }
  0x11   :  { %v943_v17 = vmul.f32 0.0625, %v43_v16 }
  0x12   :  { %v429_v51 = vadd.f32 %v428_v50, %v427_v49 }
  0x13   :  { %v46_v18 = vsub.f32 %v32_v1, %v943_v17  ;;  %v47_v19 = vsub.f32 %v33_v2, %v943_v17 }
  0x14   :  { %v999_v52 = vmul.f32 0.0625, %v429_v51 }
  0x15   :  { %v48_v20 = vmul.f32 %v46_v18, %v46_v18  ;;  %v49_v21 = vmul.f32 %v47_v19, %v47_v19 }
  0x16   :  { %v431_v53 = vsub.f32 %v778_v41, %v999_v52  ;;  %v432_v54 = vsub.f32 %v779_v42, %v999_v52 }
  0x17   :  { %v50_v22 = vsel %vm34_vm0, %v48_v20, 0.0  ;;  %v51_v23 = vsel %vm34_vm0, %v49_v21, 0.0  ;;  %v767_v21 = vld [vmem:[%s1077_s3 + $0x8] sm:$0xf] }
  0x18   :  { %v52_v24 = vadd.f32 %v51_v23, %v50_v22  ;;  %v433_v55 = vmul.f32 %v431_v53, %v431_v53  ;;  %v434_v56 = vmul.f32 %v432_v54, %v432_v54 }
  0x1a   :  { %v53_v25 = vrot.slane %v52_v24, 4  ;;  %v435_v57 = vsel %vm34_vm0, %v433_v55, 0.0  ;;  %v436_v58 = vsel %vm34_vm0, %v434_v56, 0.0 }
  0x1b   :  { %v437_v59 = vadd.f32 %v436_v58, %v435_v57 }
  0x1c   :  { %v54_v26 = vadd.f32 %v53_v25, %v52_v24 }
  0x1d   :  { %v438_v60 = vrot.slane %v437_v59, 4 }
  0x1e   :  { %v55_v27 = vrot.slane %v54_v26, 2 }
  0x1f   :  { %v439_v61 = vadd.f32 %v438_v60, %v437_v59 }
  0x20   :  { %v56_v28 = vadd.f32 %v55_v27, %v54_v26 }
  0x21   :  { %v440_v62 = vrot.slane %v439_v61, 2 }
  0x22   :  { %v57_v29 = vrot.slane %v56_v28, 1 }
  0x23   :  { %v441_v63 = vadd.f32 %v440_v62, %v439_v61 }
  0x24   :  { %v58_v30 = vadd.f32 %v57_v29, %v56_v28  ;;  %v777_v29 = vld [vmem:[%s1078_s4] ss:$0 sm:$0xff] }
  0x25   :  { %v442_v1 = vrot.slane %v441_v63, 1 }
  0x26   :  { %v59_v31 = vmul.f32 0.0625, %v58_v30 }
  0x27   :  { %v443_v2 = vadd.f32 %v442_v1, %v441_v63 }
  0x28   :  { %v949_v32 = vadd.f32 1e-05, %v59_v31 }
  0x29   :  { %v444_v4 = vmul.f32 0.0625, %v443_v2 }
  0x2a   :  { %881 = vrsqrt.f32 %v949_v32 }
  0x2b   :  { %v1005_v5 = vadd.f32 1e-05, %v444_v4 }
  0x2d   :  { %883 = vrsqrt.f32 %v1005_v5 }
  0x34   :  { %v952_v33 = vpop.eup %881 }
  0x35   :  { %v63_v34 = vmul.f32 %v952_v33, %v46_v18  ;;  %v64_v35 = vmul.f32 %v952_v33, %v47_v19 }
  0x37   :  { %v869_v36 = vpack.c.bf16 %v64_v35, %v63_v34  ;;  %v1008_v10 = vpop.eup %883  ;;  %v62_v35 = vmul.f32 %v952_v33, %v949_v32 }
  0x38   :  { %v448_v18 = vmul.f32 %v1008_v10, %v431_v53  ;;  %v449_v19 = vmul.f32 %v1008_v10, %v432_v54 }
  0x39   :  { %870 = vmatpush3.bf16.msra.mxu0 %v869_v36 }
  0x3a   :  { %853 = vmatprep.subr.mxu0 %v887_v3  ;;  %v872_v24 = vpack.c.bf16 %v449_v19, %v448_v18 }
  0x3c   :  { %817 = vmatmul.mubr.msk.f32.vlgmr.msra.gmra.mrb[0].mxu0 %vm80_vm2, %v959_v37 }
  0x3d   :  { %819 = vmatprep.mubr.msk.f32.mxu0 %vm886_vm1, %v887_v3  ;;  %854 = vmatpush3.msk.msra.mxu0 %vm173_vm3, %v766_v40 }
  0x3e   :  { %858 = vmatprep.subr.mxu0 %v887_v3 }
  0x40   :  { %820 = vmatmul.mubr.msk.f32.gmra.mrb[2].mxu0 %vm80_vm2, %v969_v38 }
  0x41   :  { %822 = vmatprep.mubr.msk.f32.mxu0 %vm886_vm1, %v887_v3 }
  0x44   :  { %823 = vmatmul.mubr.msk.f32.gmra.mrb[4].mxu0 %vm80_vm2, %v978_v39 }
  0x45   :  { %855 = vmatprep.mubr.msk.f32.mxu0 %vm886_vm1, %v887_v3 }
  0x82   :  { %v73_v6 = vpop.permute.xlu0 %72 }
  0x83   :  { %v78_v16 = vpop.permute.xlu1 %77 }
  0x86   :  { %v68_v14 = vpop.permute.xlu0 %67 }
 0x10f   :  { %v156_v7 = vpop.f32.mrb[0].mxu0 }
 0x110   :  { %v818_v8 = vpop.f32.mrb[1].mxu0  ;;  %v157_v20 = vadd.f32 %v156_v7, %v68_v14 }
 0x113   :  { %v161_v9 = vpop.f32.mrb[2].mxu0 }
 0x114   :  { %v162_v11 = vadd.f32 %v161_v9, %v73_v6  ;;  %v821_v12 = vpop.f32.mrb[3].mxu0 }
 0x116   :  { %828 = vmatmul.mubr.msk.f32.vlgmr.msra.gmra.mrb[0].mxu1 %vm34_vm0, %v162_v11  ;;  %v407_v46 = vmul.f32 %v162_v11, %v62_v35 }
 0x117   :  { %831 = vmatpush3.msk.msra.mxu1 %vm173_vm3, %v26_v13  ;;  %832 = vmatprep.mubr.msk.f32.mxu1 %vm886_vm1, %v887_v3  ;;  %v166_v15 = vpop.f32.mrb[4].mxu0 }
 0x118   :  { %835 = vmatprep.subr.mxu1 %v887_v3  ;;  %v824_v22 = vpop.f32.mrb[5].mxu0  ;;  %v167_v23 = vadd.f32 %v166_v15, %v78_v16  ;;  %v408_v47 = vadd.f32 %v407_v46, %v943_v17 }
 0x11a   :  { %833 = vmatmul.mubr.msk.f32.vlgmr.msra.gmra.mrb[2].mxu1 %vm34_vm0, %v157_v20 }
 0x11b   :  { %836 = vmatpush3.msk.msra.mxu1 %vm173_vm3, %v767_v21  ;;  %837 = vmatprep.mubr.msk.f32.mxu1 %vm886_vm1, %v887_v3 }
 0x11c   :  { %871 = vmatprep.subr.bf16.mxu1 %v885_v0 }
 0x11e   :  { %838 = vmatmul.mubr.msk.f32.vlgmr.msra.gmra.mrb[4].mxu1 %vm34_vm0, %v167_v23 }
 0x11f   :  { %873 = vmatpush3.bf16.msra.mxu1 %v872_v24  ;;  %844 = vmatprep.mubr.msk.f32.mxu1 %vm886_vm1, %v887_v3 }
 0x122   :  { %845 = vmatmul.mubr.msk.f32.vlgmr.msra.gmra.mrb[6].mxu1 %vm80_vm2, %v959_v37 }
 0x123   :  { %847 = vmatprep.mubr.msk.f32.mxu1 %vm886_vm1, %v887_v3 }
 0x126   :  { %848 = vmatmul.mubr.msk.f32.gmra.mrb[8].mxu1 %vm80_vm2, %v969_v38 }
 0x127   :  { %850 = vmatprep.mubr.msk.f32.mxu1 %vm886_vm1, %v887_v3 }
 0x12a   :  { %851 = vmatmul.mubr.msk.f32.gmra.mrb[10].mxu1 %vm80_vm2, %v978_v39 }
 0x1e9   :  { %v243_v0 = vpop.f32.mrb[0].mxu1 }
 0x1ea   :  { %v829_v25 = vpop.f32.mrb[1].mxu1 }
 0x1ed   :  { %v319_v26 = vpop.f32.mrb[2].mxu1 }
 0x1ee   :  { %v320_v27 = vadd.f32 %v319_v26, %v243_v0  ;;  %v834_v28 = vpop.f32.mrb[3].mxu1 }
 0x1f1   :  { %v395_v30 = vpop.f32.mrb[4].mxu1 }
 0x1f2   :  { %v399_v31 = vadd.f32 %v395_v30, %v320_v27  ;;  %v839_v34 = vpop.f32.mrb[5].mxu1 }
 0x1f4   :  { %v406_v36 = vadd.f32 %v777_v29, %v399_v31 }
 0x1f5   :  { %v516_v37 = vpop.f32.mrb[6].mxu1 }
 0x1f6   :  { %v409_v38 = vmul.f32 %v406_v36, %v62_v35  ;;  %v846_v40 = vpop.f32.mrb[7].mxu1  ;;  %v517_v32 = vadd.f32 %v516_v37, %v68_v14 }
 0x1f8   :  { %v410_v39 = vadd.f32 %v409_v38, %v943_v17  ;;  %v447_v17 = vmul.f32 %v1008_v10, %v1005_v5 }
 0x1f9   :  { %v521_v41 = vpop.f32.mrb[8].mxu1 }
 0x1fa   :  { %v522_v42 = vadd.f32 %v521_v41, %v73_v6  ;;  %v849_v43 = vpop.f32.mrb[9].mxu1  ;;  %412 = vrot.lane.b32.xlu1 %v410_v39, %s889_s17 }
 0x1fc   :  { %856 = vmatmul.mubr.msk.f32.vlgmr.msra.gmra.mrb[6].mxu0 %vm34_vm0, %v522_v42  ;;  %v751_v61 = vmul.f32 %v522_v42, %v447_v17 }
 0x1fd   :  { %859 = vmatpush3.msk.msra.mxu0 %vm173_vm3, %v26_v13  ;;  %v526_v44 = vpop.f32.mrb[10].mxu1  ;;  %860 = vmatprep.mubr.msk.f32.mxu0 %vm886_vm1, %v887_v3 }
 0x1fe   :  { %863 = vmatprep.subr.mxu0 %v887_v3  ;;  %v852_v33 = vpop.f32.mrb[11].mxu1  ;;  %v527_v45 = vadd.f32 %v526_v44, %v78_v16  ;;  %v752_v62 = vadd.f32 %v751_v61, %v999_v52 }
 0x200   :  { %861 = vmatmul.mubr.msk.f32.vlgmr.msra.gmra.mrb[8].mxu0 %vm34_vm0, %v517_v32 }
 0x201   :  { %864 = vmatpush3.msk.msra.mxu0 %vm173_vm3, %v767_v21  ;;  %865 = vmatprep.mubr.msk.f32.mxu0 %vm886_vm1, %v887_v3 }
 0x204   :  { %866 = vmatmul.mubr.msk.f32.vlgmr.msra.gmra.mrb[10].mxu0 %vm34_vm0, %v527_v45 }
 0x26c   :  { %v413_v48 = vpop.permute.xlu1 %412 }
 0x26d   :  { %v415_v49 = vsel %vm34_vm0, %v408_v47, %v413_v48 }
 0x26e   :  { %417 = vst.msk [vmem:[%s1079_s5] sm:$0xff] %vm416_vm4, %v415_v49 }
 0x2cf   :  { %v599_v50 = vpop.f32.mrb[6].mxu0 }
 0x2d0   :  { %v857_v51 = vpop.f32.mrb[7].mxu0 }
 0x2d3   :  { %v672_v53 = vpop.f32.mrb[8].mxu0 }
 0x2d4   :  { %v673_v54 = vadd.f32 %v672_v53, %v599_v50  ;;  %v862_v3 = vpop.f32.mrb[9].mxu0 }
 0x2d7   :  { %v745_v55 = vpop.f32.mrb[10].mxu0 }
 0x2d8   :  { %v749_v56 = vadd.f32 %v745_v55, %v673_v54  ;;  %v867_v57 = vpop.f32.mrb[11].mxu0 }
 0x2da   :  { %v750_v58 = vadd.f32 %v777_v29, %v749_v56 }
 0x2dc   :  { %v753_v59 = vmul.f32 %v750_v58, %v447_v17 }
 0x2de   :  { %v754_v60 = vadd.f32 %v753_v59, %v999_v52 }
 0x2e0   :  { %756 = vrot.lane.b32.xlu0 %v754_v60, %s889_s17 }
 0x352   :  { %v757_v63 = vpop.permute.xlu0 %756 }
 0x353   :  { %v759_v1 = vsel %vm34_vm0, %v752_v62, %v757_v63 }
 0x354   :  { %789 = vst.msk [vmem:[%s1079_s5 + $0x8] sm:$0xff] %vm416_vm4, %v759_v1 }

</bundles_post_ra>
